<compile_context>
chip_gen: v6e
topology: v6e:2x2x1
jax: 0.10.0
libtpu: 0.0.40
codegen_flags: <defaults>
</compile_context>

<pallas_src>
from functools import partial

import jax
import jax.numpy as jnp
from jax import lax
from jax.experimental import pallas as pl
from jax.experimental.pallas import tpu as pltpu


# ----------------------------- Pallas kernel -------------------------------

def _gelu_exact(x):
    # nn.GELU() default is the exact (erf) form.
    return 0.5 * x * (1.0 + lax.erf(x * 0.7071067811865476))


def cvfm_kernel(inv_dv, vit_ref, al_ref, w1v_ref, w1c_ref, b1_ref, w2_ref,
                b2_ref, gamma_ref, beta_ref, gate_ref, out_ref):
    vit = vit_ref[...]                                   # (tm, Dv_p) f32

    # combined = concat([vit, aligned], -1);  combined @ W1 == vit@W1v + al@W1c
    # bf16 x bf16 -> f32 is the native MXU path; accumulation stays f32.
    h = (jnp.dot(vit.astype(jnp.bfloat16), w1v_ref[...],
                 preferred_element_type=jnp.float32)
         + jnp.dot(al_ref[...], w1c_ref[...],
                   preferred_element_type=jnp.float32)
         + b1_ref[...])                                  # (tm, Dh_p) f32
    h = _gelu_exact(h)
    mlp = (jnp.dot(h.astype(jnp.bfloat16), w2_ref[...],
                   preferred_element_type=jnp.float32)
           + b2_ref[...])                                # (tm, Dv_p) f32

    g = gate_ref[0, 0]                                   # tanh(gate) from SMEM
    x = vit + g * mlp                                    # gated residual (f32)

    # LayerNorm over the *real* vit_dim.  Padded feature columns of x are
    # exactly zero (zero-padded vit, zero W2 cols / b2), so plain lane sums
    # divided by the true dim give exact mean / E[x^2]; var = E[x^2] - mu^2.
    mu = jnp.sum(x, axis=-1, keepdims=True) * inv_dv
    ex2 = jnp.sum(x * x, axis=-1, keepdims=True) * inv_dv
    var = ex2 - mu * mu
    xn = (x - mu) * lax.rsqrt(var + 1e-5)                # eps = PyTorch default
    out_ref[...] = (xn * gamma_ref[...] + beta_ref[...]).astype(out_ref.dtype)


def _round_up(x, m):
    return (x + m - 1) // m * m


def cvfm_pallas(vit2d, al2d, w1v, w1c, b1, w2, b2, gamma, beta, gate, *, tm=256):
    M, Dv = vit2d.shape
    Dc = al2d.shape[1]
    Dh = w1v.shape[1]

    # Lane-dense feature dims (multiples of 128).  Zero padding is exact:
    # padded weight rows/cols and biases are zero, so padded activation
    # columns stay exactly zero and are sliced off afterwards.
    Dv_p = _round_up(Dv, 128)
    Dc_p = _round_up(Dc, 128)
    Dh_p = _round_up(Dh, 128)

    # Row tile: large enough to fill MXU rows / amortize per-step overhead,
    # but never over-pad tiny inputs, and keep >= 2 grid steps when possible
    # so v7x's two TensorCores both get a share of the parallel token axis.
    tm = max(8, min(tm, _round_up(M, 8)))
    if _round_up(M, tm) // tm < 2 and M > 16:
        tm = _round_up((M + 1) // 2, 8)
    M_pad = _round_up(M, tm)

    f32, bf16 = jnp.float32, jnp.bfloat16
    vit_p = jnp.pad(vit2d, ((0, M_pad - M), (0, Dv_p - Dv)))              # f32
    al_p = jnp.pad(al2d, ((0, M_pad - M), (0, Dc_p - Dc))).astype(bf16)
    w1v_p = jnp.pad(w1v, ((0, Dv_p - Dv), (0, Dh_p - Dh))).astype(bf16)
    w1c_p = jnp.pad(w1c, ((0, Dc_p - Dc), (0, Dh_p - Dh))).astype(bf16)
    w2_p = jnp.pad(w2, ((0, Dh_p - Dh), (0, Dv_p - Dv))).astype(bf16)
    b1_p = jnp.pad(b1, ((0, 0), (0, Dh_p - Dh))).astype(f32)
    b2_p = jnp.pad(b2, ((0, 0), (0, Dv_p - Dv))).astype(f32)
    gamma_p = jnp.pad(gamma, ((0, 0), (0, Dv_p - Dv))).astype(f32)
    beta_p = jnp.pad(beta, ((0, 0), (0, Dv_p - Dv))).astype(f32)
    gate_t = jnp.tanh(gate).reshape(1, 1).astype(f32)    # tanh once, to SMEM

    flops = 2 * M_pad * (Dv_p + Dc_p) * Dh_p + 2 * M_pad * Dh_p * Dv_p
    bytes_accessed = (M_pad * Dv_p * 4            # vit tokens (f32, in)
                      + M_pad * Dc_p * 2          # aligned tokens (bf16, in)
                      + (Dv_p + Dc_p) * Dh_p * 2  # W1 halves (bf16)
                      + Dh_p * Dv_p * 2           # W2 (bf16)
                      + (Dh_p + 3 * Dv_p) * 4     # biases + LN affine (f32)
                      + M_pad * Dv_p * 4)         # output (f32)

    # NOTE(v7x): the three weight BlockSpecs have constant index_maps, so
    # single-buffering them (pipeline_mode=pl.Buffered(1)) would halve their
    # VMEM footprint on 64 MiB parts; left at the default double-buffering
    # here for portability across jax versions.
    out = pl.pallas_call(
        partial(cvfm_kernel, 1.0 / Dv),
        out_shape=jax.ShapeDtypeStruct((M_pad, Dv_p), vit2d.dtype),
        grid_spec=pltpu.PrefetchScalarGridSpec(
            num_scalar_prefetch=0,
            grid=(M_pad // tm,),
            in_specs=[
                pl.BlockSpec((tm, Dv_p), lambda i: (i, 0)),    # vit tokens (f32)
                pl.BlockSpec((tm, Dc_p), lambda i: (i, 0)),    # aligned tokens (bf16)
                pl.BlockSpec((Dv_p, Dh_p), lambda i: (0, 0)),  # W1 vit rows (bf16)
                pl.BlockSpec((Dc_p, Dh_p), lambda i: (0, 0)),  # W1 conv rows (bf16)
                pl.BlockSpec((1, Dh_p), lambda i: (0, 0)),     # b1
                pl.BlockSpec((Dh_p, Dv_p), lambda i: (0, 0)),  # W2 (bf16)
                pl.BlockSpec((1, Dv_p), lambda i: (0, 0)),     # b2
                pl.BlockSpec((1, Dv_p), lambda i: (0, 0)),     # LN gamma
                pl.BlockSpec((1, Dv_p), lambda i: (0, 0)),     # LN beta
                pl.BlockSpec(memory_space=pltpu.MemorySpace.SMEM),  # tanh(gate)
            ],
            out_specs=pl.BlockSpec((tm, Dv_p), lambda i: (i, 0)),
        ),
        compiler_params=pltpu.CompilerParams(
            dimension_semantics=("parallel",),
            vmem_limit_bytes=48 * 1024 * 1024),
        cost_estimate=pl.CostEstimate(
            flops=flops,
            transcendentals=M_pad * Dh_p,   # erf over the GELU intermediate
            bytes_accessed=bytes_accessed),
    )(vit_p, al_p, w1v_p, w1c_p, b1_p, w2_p, b2_p, gamma_p, beta_p, gate_t)
    return out[:M, :Dv]


# ------------------------------ JAX glue ------------------------------------
# TODO(synk): the bilinear resize / cls-mean / concat are gather-shaped and
# memory-light, so they stay as XLA glue instead of a Pallas kernel.

def _src_idx(out_size, in_size):
    # PyTorch F.interpolate bilinear, align_corners=False.
    scale = in_size / out_size
    i = jnp.arange(out_size, dtype=jnp.float32)
    src = (i + 0.5) * scale - 0.5
    src = jnp.maximum(src, 0.0)
    i0 = jnp.minimum(jnp.floor(src).astype(jnp.int32), in_size - 1)
    i1 = jnp.minimum(i0 + 1, in_size - 1)
    w1 = src - i0.astype(jnp.float32)
    w0 = 1.0 - w1
    return i0, i1, w0, w1


def bilinear_resize_nchw(x, out_h, out_w):
    B, C, H, W = x.shape
    y0, y1, wy0, wy1 = _src_idx(out_h, H)
    x0, x1, wx0, wx1 = _src_idx(out_w, W)
    r0 = x[:, :, y0, :]
    r1 = x[:, :, y1, :]
    rows = r0 * wy0[None, None, :, None] + r1 * wy1[None, None, :, None]
    c0 = rows[:, :, :, x0]
    c1 = rows[:, :, :, x1]
    return c0 * wx0[None, None, None, :] + c1 * wx1[None, None, None, :]


def _aligned_tokens(vit_features, convnext_features):
    B, N, _ = vit_features.shape
    h = w = int((N - 1) ** 0.5)
    aligned = bilinear_resize_nchw(
        convnext_features.astype(vit_features.dtype), h, w)
    Dc = aligned.shape[1]
    aligned = aligned.reshape(B, Dc, h * w).transpose(0, 2, 1)
    cls_feat = jnp.mean(aligned, axis=1, keepdims=True)
    return jnp.concatenate([cls_feat, aligned], axis=1)          # (B, N, Dc)


def cvfm_forward(vit_features, convnext_features, params):
    B, N, Dv = vit_features.shape
    aligned = _aligned_tokens(vit_features, convnext_features)
    Dc = aligned.shape[-1]

    vit2d = vit_features.reshape(B * N, Dv)
    al2d = aligned.reshape(B * N, Dc)

    out = cvfm_pallas(vit2d, al2d,
                      params["w1v"], params["w1c"], params["b1"],
                      params["w2"], params["b2"],
                      params["gamma"], params["beta"], params["gate"])
    return out.reshape(B, N, Dv)


def cvfm_reference(vit_features, convnext_features, params):
    # pure-JAX reference of the same forward pass (f32, HIGHEST precision)
    aligned = _aligned_tokens(vit_features, convnext_features)
    combined = jnp.concatenate([vit_features, aligned], axis=-1)
    w1 = jnp.concatenate([params["w1v"], params["w1c"]], axis=0)
    hdn = jnp.dot(combined, w1, precision=lax.Precision.HIGHEST) + params["b1"]
    hdn = _gelu_exact(hdn)
    mlp = jnp.dot(hdn, params["w2"], precision=lax.Precision.HIGHEST) + params["b2"]
    x = vit_features + jnp.tanh(params["gate"][0, 0]) * mlp
    mu = jnp.mean(x, axis=-1, keepdims=True)
    var = jnp.mean(jnp.square(x - mu), axis=-1, keepdims=True)
    xn = (x - mu) * lax.rsqrt(var + 1e-5)
    return xn * params["gamma"] + params["beta"]


# --------------------------------- main --------------------------------------

if __name__ == "__main__":
    key = jax.random.PRNGKey(0)
    B, vit_dim, convnext_dim = 2, 32, 16
    h = w = 4
    N = h * w + 1                # 17 tokens (cls + patches)
    Hc = Wc = 8                  # convnext spatial, gets resized to (h, w)
    Dh = vit_dim * 4

    ks = jax.random.split(key, 8)
    vit_features = jax.random.normal(ks[0], (B, N, vit_dim), jnp.float32)
    convnext_features = jax.random.normal(ks[1], (B, convnext_dim, Hc, Wc),
                                          jnp.float32)

    # deterministic synthetic parameters (shapes from CVFM.__init__)
    params = {
        "w1v": 0.05 * jax.random.normal(ks[2], (vit_dim, Dh), jnp.float32),
        "w1c": 0.05 * jax.random.normal(ks[3], (convnext_dim, Dh), jnp.float32),
        "b1": 0.01 * jax.random.normal(ks[4], (1, Dh), jnp.float32),
        "w2": 0.05 * jax.random.normal(ks[5], (Dh, vit_dim), jnp.float32),
        "b2": 0.01 * jax.random.normal(ks[6], (1, vit_dim), jnp.float32),
        "gamma": jnp.ones((1, vit_dim), jnp.float32),   # LayerNorm default init
        "beta": jnp.zeros((1, vit_dim), jnp.float32),
        # module inits gate to 0 (tanh(0)=0 makes the MLP branch vanish);
        # use a nonzero value so the kernel path is actually exercised.
        "gate": jnp.full((1, 1), 0.5, jnp.float32),
    }

    out = cvfm_forward(vit_features, convnext_features, params)
    out = jax.block_until_ready(out)

    ref = cvfm_reference(vit_features, convnext_features, params)
    assert out.shape == (B, N, vit_dim)
    assert jnp.allclose(out, ref, rtol=1e-2, atol=1e-2), (
        float(jnp.max(jnp.abs(out - ref))))
    print("KERNEL_OK")
</pallas_src>

<mosaic_0001>
module attributes {stable_mosaic.version = 11 : i64} {
  func.func @cvfm_kernel(%arg0: i32, %arg1: memref<24x128xf32, #tpu.memory_space<vmem>>, %arg2: memref<24x128xbf16, #tpu.memory_space<vmem>>, %arg3: memref<128x128xbf16, #tpu.memory_space<vmem>>, %arg4: memref<128x128xbf16, #tpu.memory_space<vmem>>, %arg5: memref<1x128xf32, #tpu.memory_space<vmem>>, %arg6: memref<128x128xbf16, #tpu.memory_space<vmem>>, %arg7: memref<1x128xf32, #tpu.memory_space<vmem>>, %arg8: memref<1x128xf32, #tpu.memory_space<vmem>>, %arg9: memref<1x128xf32, #tpu.memory_space<vmem>>, %arg10: memref<1x1xf32, #tpu.memory_space<smem>>, %arg11: memref<24x128xf32, #tpu.memory_space<vmem>>) attributes {dimension_semantics = [#tpu.dimension_semantics<parallel>], iteration_bounds = array<i64: 2>, scalar_prefetch = 0 : i64, scratch_operands = 0 : i64, tpu.core_type = #tpu.core_type<tc>, window_params = [{transform_indices = @transform_0, window_bounds = array<i64: 24, 128>}, {transform_indices = @transform_1, window_bounds = array<i64: 24, 128>}, {pipeline_mode = #tpu.pipeline_mode<synchronous>, transform_indices = @transform_2, window_bounds = array<i64: 128, 128>}, {pipeline_mode = #tpu.pipeline_mode<synchronous>, transform_indices = @transform_3, window_bounds = array<i64: 128, 128>}, {pipeline_mode = #tpu.pipeline_mode<synchronous>, transform_indices = @transform_4, window_bounds = array<i64: 1, 128>}, {pipeline_mode = #tpu.pipeline_mode<synchronous>, transform_indices = @transform_5, window_bounds = array<i64: 128, 128>}, {pipeline_mode = #tpu.pipeline_mode<synchronous>, transform_indices = @transform_6, window_bounds = array<i64: 1, 128>}, {pipeline_mode = #tpu.pipeline_mode<synchronous>, transform_indices = @transform_7, window_bounds = array<i64: 1, 128>}, {pipeline_mode = #tpu.pipeline_mode<synchronous>, transform_indices = @transform_8, window_bounds = array<i64: 1, 128>}, {transform_indices = @transform_9, window_bounds = array<i64: 1, 1>}, {transform_indices = @transform_10, window_bounds = array<i64: 24, 128>}]} {
    %c0 = arith.constant 0 : index
    %c0_0 = arith.constant 0 : index
    %0 = vector.load %arg1[%c0, %c0_0] : memref<24x128xf32, #tpu.memory_space<vmem>>, vector<24x128xf32>
    %1 = arith.truncf %0 : vector<24x128xf32> to vector<24x128xbf16>
    %c0_1 = arith.constant 0 : index
    %c0_2 = arith.constant 0 : index
    %2 = vector.load %arg3[%c0_1, %c0_2] : memref<128x128xbf16, #tpu.memory_space<vmem>>, vector<128x128xbf16>
    %cst = arith.constant dense<0.000000e+00> : vector<24x128xf32>
    %3 = tpu.matmul %1, %2, %cst {dimension_numbers = #tpu.dot_dimension_numbers<[1], [0], [0], [1], [0, 0, 1, 1], [], []>} : vector<24x128xbf16>, vector<128x128xbf16>, vector<24x128xf32> -> vector<24x128xf32>
    %c0_3 = arith.constant 0 : index
    %c0_4 = arith.constant 0 : index
    %4 = vector.load %arg2[%c0_3, %c0_4] : memref<24x128xbf16, #tpu.memory_space<vmem>>, vector<24x128xbf16>
    %c0_5 = arith.constant 0 : index
    %c0_6 = arith.constant 0 : index
    %5 = vector.load %arg4[%c0_5, %c0_6] : memref<128x128xbf16, #tpu.memory_space<vmem>>, vector<128x128xbf16>
    %cst_7 = arith.constant dense<0.000000e+00> : vector<24x128xf32>
    %6 = tpu.matmul %4, %5, %cst_7 {dimension_numbers = #tpu.dot_dimension_numbers<[1], [0], [0], [1], [0, 0, 1, 1], [], []>} : vector<24x128xbf16>, vector<128x128xbf16>, vector<24x128xf32> -> vector<24x128xf32>
    %7 = arith.addf %3, %6 : vector<24x128xf32>
    %c0_8 = arith.constant 0 : index
    %c0_9 = arith.constant 0 : index
    %8 = vector.load %arg5[%c0_8, %c0_9] : memref<1x128xf32, #tpu.memory_space<vmem>>, vector<1x128xf32>
    %9 = vector.broadcast %8 : vector<1x128xf32> to vector<24x128xf32>
    %10 = arith.addf %7, %9 : vector<24x128xf32>
    %cst_10 = arith.constant 5.000000e-01 : f32
    %11 = vector.broadcast %cst_10 : f32 to vector<24x128xf32>
    %12 = arith.mulf %11, %10 : vector<24x128xf32>
    %cst_11 = arith.constant 0.707106769 : f32
    %13 = vector.broadcast %cst_11 : f32 to vector<24x128xf32>
    %14 = arith.mulf %10, %13 : vector<24x128xf32>
    %15 = math.erf %14 : vector<24x128xf32>
    %cst_12 = arith.constant 1.000000e+00 : f32
    %16 = vector.broadcast %cst_12 : f32 to vector<24x128xf32>
    %17 = arith.addf %16, %15 : vector<24x128xf32>
    %18 = arith.mulf %12, %17 : vector<24x128xf32>
    %19 = arith.truncf %18 : vector<24x128xf32> to vector<24x128xbf16>
    %c0_13 = arith.constant 0 : index
    %c0_14 = arith.constant 0 : index
    %20 = vector.load %arg6[%c0_13, %c0_14] : memref<128x128xbf16, #tpu.memory_space<vmem>>, vector<128x128xbf16>
    %cst_15 = arith.constant dense<0.000000e+00> : vector<24x128xf32>
    %21 = tpu.matmul %19, %20, %cst_15 {dimension_numbers = #tpu.dot_dimension_numbers<[1], [0], [0], [1], [0, 0, 1, 1], [], []>} : vector<24x128xbf16>, vector<128x128xbf16>, vector<24x128xf32> -> vector<24x128xf32>
    %c0_16 = arith.constant 0 : index
    %c0_17 = arith.constant 0 : index
    %22 = vector.load %arg7[%c0_16, %c0_17] : memref<1x128xf32, #tpu.memory_space<vmem>>, vector<1x128xf32>
    %23 = vector.broadcast %22 : vector<1x128xf32> to vector<24x128xf32>
    %24 = arith.addf %21, %23 : vector<24x128xf32>
    %c0_18 = arith.constant 0 : index
    %c0_19 = arith.constant 0 : index
    %25 = memref.load %arg10[%c0_18, %c0_19] : memref<1x1xf32, #tpu.memory_space<smem>>
    %26 = vector.broadcast %25 : f32 to vector<24x128xf32>
    %27 = arith.mulf %26, %24 : vector<24x128xf32>
    %28 = arith.addf %0, %27 : vector<24x128xf32>
    %cst_20 = arith.constant dense<0.000000e+00> : vector<24xf32>
    %29 = vector.multi_reduction <add>, %28, %cst_20 [1] : vector<24x128xf32> to vector<24xf32>
    %30 = vector.shape_cast %29 : vector<24xf32> to vector<24x1xf32>
    %cst_21 = arith.constant 3.125000e-02 : f32
    %31 = vector.broadcast %cst_21 : f32 to vector<24x1xf32>
    %32 = arith.mulf %30, %31 : vector<24x1xf32>
    %33 = arith.mulf %28, %28 : vector<24x128xf32>
    %cst_22 = arith.constant dense<0.000000e+00> : vector<24xf32>
    %34 = vector.multi_reduction <add>, %33, %cst_22 [1] : vector<24x128xf32> to vector<24xf32>
    %35 = vector.shape_cast %34 : vector<24xf32> to vector<24x1xf32>
    %cst_23 = arith.constant 3.125000e-02 : f32
    %36 = vector.broadcast %cst_23 : f32 to vector<24x1xf32>
    %37 = arith.mulf %35, %36 : vector<24x1xf32>
    %38 = arith.mulf %32, %32 : vector<24x1xf32>
    %39 = arith.subf %37, %38 : vector<24x1xf32>
    %40 = vector.broadcast %32 : vector<24x1xf32> to vector<24x128xf32>
    %41 = arith.subf %28, %40 : vector<24x128xf32>
    %cst_24 = arith.constant 9.99999974E-6 : f32
    %42 = vector.broadcast %cst_24 : f32 to vector<24x1xf32>
    %43 = arith.addf %39, %42 : vector<24x1xf32>
    %44 = math.rsqrt %43 : vector<24x1xf32>
    %45 = vector.broadcast %44 : vector<24x1xf32> to vector<24x128xf32>
    %46 = arith.mulf %41, %45 : vector<24x128xf32>
    %c0_25 = arith.constant 0 : index
    %c0_26 = arith.constant 0 : index
    %47 = vector.load %arg8[%c0_25, %c0_26] : memref<1x128xf32, #tpu.memory_space<vmem>>, vector<1x128xf32>
    %48 = vector.broadcast %47 : vector<1x128xf32> to vector<24x128xf32>
    %49 = arith.mulf %46, %48 : vector<24x128xf32>
    %c0_27 = arith.constant 0 : index
    %c0_28 = arith.constant 0 : index
    %50 = vector.load %arg9[%c0_27, %c0_28] : memref<1x128xf32, #tpu.memory_space<vmem>>, vector<1x128xf32>
    %51 = vector.broadcast %50 : vector<1x128xf32> to vector<24x128xf32>
    %52 = arith.addf %49, %51 : vector<24x128xf32>
    %c0_29 = arith.constant 0 : index
    %c0_30 = arith.constant 0 : index
    %53 = vector.load %arg11[%c0_29, %c0_30] : memref<24x128xf32, #tpu.memory_space<vmem>>, vector<24x128xf32>
    tpu.vector_store %arg11[%c0_29, %c0_30], %52 {strides = array<i32>} : memref<24x128xf32, #tpu.memory_space<vmem>>, vector<24x128xf32>,
    return
  }
  func.func @transform_0(%arg0: i32) -> (i32, i32) {
    %c0_i32 = arith.constant 0 : i32
    %c0_i32_0 = arith.constant 0 : i32
    return %arg0, %c0_i32 : i32, i32
  }
  func.func @transform_1(%arg0: i32) -> (i32, i32) {
    %c0_i32 = arith.constant 0 : i32
    %c0_i32_0 = arith.constant 0 : i32
    return %arg0, %c0_i32 : i32, i32
  }
  func.func @transform_2(%arg0: i32) -> (i32, i32) {
    %c0_i32 = arith.constant 0 : i32
    %c0_i32_0 = arith.constant 0 : i32
    %c0_i32_1 = arith.constant 0 : i32
    return %c0_i32, %c0_i32_0 : i32, i32
  }
  func.func @transform_3(%arg0: i32) -> (i32, i32) {
    %c0_i32 = arith.constant 0 : i32
    %c0_i32_0 = arith.constant 0 : i32
    %c0_i32_1 = arith.constant 0 : i32
    return %c0_i32, %c0_i32_0 : i32, i32
  }
  func.func @transform_4(%arg0: i32) -> (i32, i32) {
    %c0_i32 = arith.constant 0 : i32
    %c0_i32_0 = arith.constant 0 : i32
    %c0_i32_1 = arith.constant 0 : i32
    return %c0_i32, %c0_i32_0 : i32, i32
  }
  func.func @transform_5(%arg0: i32) -> (i32, i32) {
    %c0_i32 = arith.constant 0 : i32
    %c0_i32_0 = arith.constant 0 : i32
    %c0_i32_1 = arith.constant 0 : i32
    return %c0_i32, %c0_i32_0 : i32, i32
  }
  func.func @transform_6(%arg0: i32) -> (i32, i32) {
    %c0_i32 = arith.constant 0 : i32
    %c0_i32_0 = arith.constant 0 : i32
    %c0_i32_1 = arith.constant 0 : i32
    return %c0_i32, %c0_i32_0 : i32, i32
  }
  func.func @transform_7(%arg0: i32) -> (i32, i32) {
    %c0_i32 = arith.constant 0 : i32
    %c0_i32_0 = arith.constant 0 : i32
    %c0_i32_1 = arith.constant 0 : i32
    return %c0_i32, %c0_i32_0 : i32, i32
  }
  func.func @transform_8(%arg0: i32) -> (i32, i32) {
    %c0_i32 = arith.constant 0 : i32
    %c0_i32_0 = arith.constant 0 : i32
    %c0_i32_1 = arith.constant 0 : i32
    return %c0_i32, %c0_i32_0 : i32, i32
  }
  func.func @transform_9(%arg0: i32) -> (i32, i32) {
    %c0_i32 = arith.constant 0 : i32
    %c0_i32_0 = arith.constant 0 : i32
    %c0_i32_1 = arith.constant 0 : i32
    return %c0_i32, %c0_i32_0 : i32, i32
  }
  func.func @transform_10(%arg0: i32) -> (i32, i32) {
    %c0_i32 = arith.constant 0 : i32
    %c0_i32_0 = arith.constant 0 : i32
    return %arg0, %c0_i32 : i32, i32
  }
}

</mosaic_0001>

<bundles_post_ra>
// kernel: tpu_custom_call.1
= control target key start
LH: loop header
LB: loop body
LE: loop exit
PB: predicated region body
PF: predicated region fallthrough
CT: control target
= control target key end

     0   :  { %s1909_s0 = inlined_call_operand.hbm [shape: f32[48,128], index: 0, kind: input, shape index: {}]   ;;  %s1910_s1 = inlined_call_operand.hbm [shape: bf16[48,128], index: 1, kind: input, shape index: {}]   ;;  %s1911_s2 = inlined_call_operand.hbm [shape: bf16[128,128], index: 2, kind: input, shape index: {}]   ;;  %s1912_s3 = inlined_call_operand.hbm [shape: bf16[128,128], index: 3, kind: input, shape index: {}]   ;;  %s1913_s4 = inlined_call_operand.vmem [shape: f32[1,128], index: 4, kind: input, shape index: {}]   ;;  %s1914_s5 = inlined_call_operand.hbm [shape: bf16[128,128], index: 5, kind: input, shape index: {}]   ;;  %s1915_s6 = inlined_call_operand.vmem [shape: f32[1,128], index: 6, kind: input, shape index: {}]   ;;  %s1916_s7 = inlined_call_operand.vmem [shape: f32[1,128], index: 7, kind: input, shape index: {}]   ;;  %s1917_s8 = inlined_call_operand.vmem [shape: f32[1,128], index: 8, kind: input, shape index: {}]   ;;  %s1918_s9 = inlined_call_operand.<no memory space> [shape: f32[1,1], index: 9, kind: input, shape index: {}]   ;;  %s1919_s10 = inlined_call_operand.hbm [shape: f32[48,128], index: 10, kind: output, shape index: {}]  }
   0x1   :  { %1928 = sst [smem:[#allocation21_spill]] %s1909_s0 }
   0x2   :  { %1929 = sst [smem:[#allocation22_spill]] %s1911_s2 }
   0x3   :  { %1930 = sst [smem:[#allocation23_spill]] %s1912_s3 }
   0x4   :  { %1931 = sst [smem:[#allocation24_spill]] %s1914_s5 }
   0x5   :  { %15 = sst [smem:[#allocation2]] %s1918_s9 }
   0x6   :  { %16 = vsyncpa [#allocation4], 0 }
   0x7   :  { %18 = vsyncpa [#allocation4 + $0x1], 0 }
   0x8   :  { %19 = vsyncpa [#allocation7], 0 }
   0x9   :  { %21 = vsyncpa [#allocation7 + $0x1], 0 }
   0xa   :  { %22 = vsyncpa [#allocation10], 0 }
   0xb   :  { %23 = vsyncpa [#allocation5], 0 }
   0xc   :  { %25 = vsyncpa [#allocation5 + $0x1], 0  ;;  %s1612_s15 = smov 0   ;;  %s1614_s16 = smov 0  }
   0xd   :  { %s1616_s17 = smov 0   ;;  %s1618_s18 = smov 0  }
   0xe LB: > { %1932 = sst [smem:[#allocation18_spill]] %s1536_s17  ;;  %s1633_s9 = sadd.s32 4294967295, %s1540_s18   ;;  %s1540_s18 = sphi %s1618_s18, %s1955_s18   ;;  %s1536_s17 = sphi %s1616_s17, %s1957_s17   ;;  %s1532_s16 = sphi %s1614_s16, %s1959_s16   ;;  %s1528_s15 = sphi %s1612_s15, %s1958_s15  }
   0xf   : > { %s1062_s19 = sadd.s32 4294967294, %s1540_s18   ;;  %p51_p0 = scmp.ne.s32.totalorder %s1532_s16, %s1528_s15 }
  0x10   : > { %p1920_p1 = scmp.eq.s32.totalorder %s1633_s9, 0  ;;  %p269_p2 = scmp.eq.s32.totalorder %s1633_s9, 1 }
  0x11   : > { %p275_p3 = scmp.eq.s32.totalorder %s1062_s19, 1  ;;  %p1063_p5 = scmp.ge.s32.totalorder %s1540_s18, 1 }
  0x12   : > { %p1642_p4 = por %p1920_p1, %p51_p0  ;;  %p282_p7 = scmp.lt.s32.totalorder %s1540_s18, 3 }
  0x13   : > { %p1647_p6 = por %p275_p3, %p51_p0  ;;  %s1542_s23 = smov [#allocation8]  }
  0x14   : > { %s1933_s20 = scalar_select %p1642_p4, 1, 0 }
  0x15   : > { %s1934_s21 = scalar_select %p1647_p6, 1, 0 }
  0x16   : > { %p1652_p8 = pnand %p1063_p5, %p282_p7  ;;  %s294_s24 = sshll.u32 %s1542_s23, 4  ;;  %s295_s24 = int_to_ptr.vmem [resolvable:$true] %s294_s24 }
  0x17   : > { %s1543_s26 = smov [#allocation9]   ;;  %s1544_s28 = smov [#allocation11]  }
  0x18   : > { %p1222_p9 = pneg %p1652_p8  ;;  %s307_s27 = sshll.u32 %s1543_s26, 4  ;;  %s308_s27 = int_to_ptr.vmem [resolvable:$true] %s307_s27 }
  0x19   : > { %s323_s29 = sshll.u32 %s1544_s28, 4  ;;  %s1341_s30 = scalar_lea.vmem %s295_s24, 1024  ;;  %s324_s29 = int_to_ptr.vmem [resolvable:$true] %s323_s29 }
  0x1a   : > { %p1661_p11 = pnand %p1222_p9, %p1920_p1  ;;  %p1342_p13 = scmp.ne.s32.totalorder %s295_s24, %s1341_s30 }
  0x1b   : > { %p1349_p5 = scmp.lt.s32.totalorder %s295_s24, %s295_s24  ;;  %p1350_p7 = scmp.lt.s32.totalorder %s1341_s30, %s1341_s30 }
  0x1c   : > { %p1332_p12 = pneg %p1661_p11 }
  0x1d   : > { %p1351_p9 = por %p1350_p7, %p1349_p5 }
  0x1e   : > { %p1344_p0 = pnand %p1342_p13, %p1332_p12 }
  0x20   : > { %p1345_p3 = pneg %p1344_p0 }
  0x22   : > { %p1352_p10 = pnand %p1351_p9, %p1345_p3 }
  0x24   : > { %1355 = shalt.err (!%p1352_p10)
}
  0x25   : > { %s1921_s11 = smov 64   ;;  %s1922_s12 = smov 4  }
  0x26   : > { %s1937_s2 = sld [smem:[#allocation22_spill]]  ;;  %s1367_s19 = scalar_lea.vmem %s308_s27, 1024 }
  0x27   : > { %p1368_p13 = scmp.ne.s32.totalorder %s308_s27, %s1367_s19  ;;  %p1375_p3 = scmp.lt.s32.totalorder %s308_s27, %s308_s27 }
  0x28   : > { %p1376_p10 = scmp.lt.s32.totalorder %s1367_s19, %s1367_s19 }
  0x29   : > { %p1370_p0 = pnand %p1368_p13, %p1332_p12 }
  0x2a   : > { %p1377_p7 = por %p1376_p10, %p1375_p3 }
  0x2b   : > { %p1371_p5 = pneg %p1370_p0 }
  0x2c   : > { %1225 = dma.hbm_to_vmem [thread:$0]  (!%p1661_p11), %s1937_s2, 1024, %s295_s24, [#allocation7], %s1921_s11, %s1921_s11, %s1922_s12  }
  0x2d   : > { %p1378_p9 = pnand %p1377_p7, %p1371_p5 }
  0x2f   : > { %1381 = shalt.err (!%p1378_p9)
}
  0x30   : > { %s1938_s3 = sld [smem:[#allocation23_spill]]  ;;  %s1393_s24 = scalar_lea.vmem %s324_s29, 1024 }
  0x31   : > { %p1394_p1 = scmp.ne.s32.totalorder %s324_s29, %s1393_s24  ;;  %p1401_p3 = scmp.lt.s32.totalorder %s324_s29, %s324_s29 }
  0x32   : > { %p1402_p5 = scmp.lt.s32.totalorder %s1393_s24, %s1393_s24 }
  0x33   : > { %p1396_p13 = pnand %p1394_p1, %p1332_p12 }
  0x34   : > { %p1403_p10 = por %p1402_p5, %p1401_p3 }
  0x35   : > { %p1397_p0 = pneg %p1396_p13 }
  0x36   : > { %1228 = dma.hbm_to_vmem [thread:$0]  (!%p1661_p11), %s1938_s3, 1024, %s308_s27, [#allocation10], %s1921_s11, %s1921_s11, %s1922_s12  }
  0x37   : > { %p1404_p7 = pnand %p1403_p10, %p1397_p0 }
  0x39   : > { %1407 = shalt.err (!%p1404_p7)
}
  0x3a   : > { %s1939_s5 = sld [smem:[#allocation24_spill]]  ;;  %s1701_s27 = sadd.s32 1, %s1540_s18  }
  0x3b   : > { %1940 = sst [smem:[#allocation19_spill]] %s1701_s27  ;;  %s35_s25 = ssub.s32 %s1540_s18, %s1701_s27 }
  0x3c   : > { %s38_s13 = sadd.s32 1, %s1536_s17  ;;  %p36_p1 = scmp.eq.s32.totalorder %s35_s25, 0 }
  0x3d   : > { %p45_p12 = scmp.ne.s32.totalorder %s1536_s17, %s1532_s16  ;;  %p46_p9 = scmp.eq.s32.totalorder %s1540_s18, 0 }
  0x3e   : > { %p1246_p13 = scmp.lt.s32.totalorder %s1540_s18, 2  ;;  %s1720_s23 = sand.u32 1, %s1536_s17  }
  0x3f   : > { %s1711_s14 = scalar_select %p36_p1, %s1536_s17, %s38_s13  }
  0x40   : > { %1231 = dma.hbm_to_vmem [thread:$0]  (!%p1661_p11), %s1939_s5, 1024, %s324_s29, [#allocation10], %s1921_s11, %s1921_s11, %s1922_s12  }
  0x41   : > { %1941 = sst [smem:[#allocation20_spill]] %s1711_s14  ;;  %p47_p0 = por %p46_p9, %p45_p12 }
  0x42   : > { %p1715_p3 = por %p269_p2, %p45_p12  ;;  %s1107_s29 = smul.u32 384, %s1540_s18 }
  0x43   : > { %s1200_s26 = smul.u32 24, %s1720_s23  ;;  %s1943_s0 = sld [smem:[#allocation21_spill]] }
  0x44   : > { %s1942_s19 = scalar_select %p1715_p3, 1, 0 }
  0x45   : > { %p1729_p11 = pnand %p1246_p13, %p47_p0  ;;  %s353_s13 = scalar_lea.vmem [#allocation3], %s1200_s26 }
  0x46   : > { %s360_s11 = sshll.u32 %s353_s13, 4  ;;  %s350_s12 = scalar_lea.sflag [#allocation4], %s1720_s23  ;;  %s1733_s11 = int_to_ptr.vmem [resolvable:$true] %s360_s11 }
  0x47   : > { %p1410_p5 = pneg %p1729_p11 }
  0x49   : > { %s1727_s30 = scalar_lea.hbm %s1943_s0, %s1107_s29  ;;  %s1413_s28 = scalar_lea.hbm %s1943_s0, 768 }
  0x4a   : > { %s1408_s2 = scalar_lea.hbm %s1727_s30, 384  ;;  %p1414_p1 = scmp.lt.s32.totalorder %s1727_s30, %s1943_s0 }
  0x4b   : > { %p1409_p2 = scmp.ne.s32.totalorder %s1727_s30, %s1408_s2  ;;  %p1415_p12 = scmp.lt.s32.totalorder %s1413_s28, %s1408_s2 }
  0x4d   : > { %p1411_p10 = pnand %p1410_p5, %p1409_p2  ;;  %p1416_p9 = por %p1415_p12, %p1414_p1 }
  0x4f   : > { %p1412_p7 = pneg %p1411_p10 }
  0x51   : > { %p1417_p13 = pnand %p1416_p9, %p1412_p7 }
  0x53   : > { %1420 = shalt.err (!%p1417_p13)
}
  0x54   : > { %s1421_s26 = scalar_lea.vmem %s1733_s11, 384  ;;  %s1547_s13 = smov [#allocation3]  }
  0x55   : > { %p1422_p0 = scmp.ne.s32.totalorder %s1733_s11, %s1421_s26  ;;  %s1426_s29 = sshll.u32 %s1547_s13, 4  ;;  %s1427_s29 = int_to_ptr.vmem [resolvable:$false] %s1426_s29 }
  0x56   : > { %s1428_s24 = scalar_lea.vmem %s1427_s29, 768  ;;  %p1429_p6 = scmp.lt.s32.totalorder %s1733_s11, %s1427_s29 }
  0x57   : > { %p1424_p2 = pnand %p1422_p0, %p1410_p5  ;;  %p1430_p3 = scmp.lt.s32.totalorder %s1428_s24, %s1421_s26 }
  0x59   : > { %p1425_p10 = pneg %p1424_p2  ;;  %p1431_p4 = por %p1430_p3, %p1429_p6 }
  0x5b   : > { %p1432_p1 = pnand %p1431_p4, %p1425_p10 }
  0x5d   : > { %1435 = shalt.err (!%p1432_p1)
}
  0x5e   : > { %s1548_s2 = smov 128   ;;  %s1549_s3 = smov 8  }
  0x5f   : > { %1235 = dma.hbm_to_vmem [thread:$0]  (!%p1729_p11), %s1727_s30, 384, %s1733_s11, %s350_s12, %s1548_s2, %s1548_s2, %s1549_s3  }
  0x60   : > { %s370_s5 = sand.u32 1, %s1540_s18   ;;  %s1201_s28 = smul.u32 12, %s1720_s23 }
  0x61   : > { %s1108_s13 = smul.u32 192, %s1540_s18  ;;  %s371_s17 = scalar_lea.sflag [#allocation7], %s370_s5 }
  0x62   : > { %s374_s0 = scalar_lea.vmem [#allocation6], %s1201_s28  ;;  %s1441_s23 = scalar_lea.hbm %s1910_s1, 384 }
  0x63   : > { %s1768_s24 = scalar_lea.hbm %s1910_s1, %s1108_s13  ;;  %s381_s14 = sshll.u32 %s374_s0, 4  ;;  %s1770_s14 = int_to_ptr.vmem [resolvable:$true] %s381_s14 }
  0x64   : > { %s1436_s27 = scalar_lea.hbm %s1768_s24, 192  ;;  %p1442_p7 = scmp.lt.s32.totalorder %s1768_s24, %s1910_s1 }
  0x65   : > { %p1437_p4 = scmp.ne.s32.totalorder %s1768_s24, %s1436_s27  ;;  %p1443_p12 = scmp.lt.s32.totalorder %s1441_s23, %s1436_s27 }
  0x67   : > { %p1439_p6 = pnand %p1437_p4, %p1410_p5  ;;  %p1444_p9 = por %p1443_p12, %p1442_p7 }
  0x69   : > { %p1440_p3 = pneg %p1439_p6 }
  0x6b   : > { %p1445_p13 = pnand %p1444_p9, %p1440_p3 }
  0x6d   : > { %1448 = shalt.err (!%p1445_p13)
}
  0x6e   : > { %s1449_s0 = scalar_lea.vmem %s1770_s14, 192  ;;  %s1550_s3 = smov [#allocation6]  }
  0x6f   : > { %p1450_p0 = scmp.ne.s32.totalorder %s1770_s14, %s1449_s0  ;;  %s1454_s5 = sshll.u32 %s1550_s3, 4  ;;  %s1455_s5 = int_to_ptr.vmem [resolvable:$false] %s1454_s5 }
  0x70   : > { %s1456_s28 = scalar_lea.vmem %s1455_s5, 384  ;;  %p1457_p1 = scmp.lt.s32.totalorder %s1770_s14, %s1455_s5 }
  0x71   : > { %p1452_p2 = pnand %p1450_p0, %p1410_p5  ;;  %p1458_p4 = scmp.lt.s32.totalorder %s1456_s28, %s1449_s0 }
  0x73   : > { %p1453_p10 = pneg %p1452_p2  ;;  %p1459_p6 = por %p1458_p4, %p1457_p1 }
  0x75   : > { %p1460_p7 = pnand %p1459_p6, %p1453_p10 }
  0x77   : > { %1463 = shalt.err (!%p1460_p7)
}
  0x78   : > { %s1945_s27 = smov 4   ;;  %s1946_s13 = smov 64  }
  0x79   : > { %1238 = dma.hbm_to_vmem [thread:$0]  (!%p1729_p11), %s1768_s24, 192, %s1770_s14, %s371_s17, %s1946_s13, %s1946_s13, %s1945_s27  }
  0x7a   : > { %393 = sbr.rel (%p1652_p8) target bundleno = 785 (0x311), region = 60  ;;  %s1800_s26 = sand.u32 (!%p1652_p8), 1, %s1532_s16  }
  0x7b   : > { %s1202_s29 = smul.u32 (!%p1652_p8), 24, %s1800_s26  ;;  %s396_s11 = scalar_lea.sflag (!%p1652_p8), [#allocation4], %s1800_s26 }
  0x7c   : > { %p1947_p5 = scmp.ne.s32.totalorder (!%p1652_p8), %s1933_s20, 0 }
  0x7d   : > { %s1806_s25 = scalar_lea.vmem (!%p1652_p8), [#allocation3], %s1202_s29 }
  0x7f   : > { %1507 = dma.done.wait (%p1947_p5), %s396_s11, 384  }
  0x80   : > { %1509 = vsyncadd (%p1947_p5), %s396_s11, 4294966912  ;;  %s404_s17 = sand.u32 1, %s1633_s9   ;;  %s1203_s22 = smul.u32 12, %s1800_s26 }
  0x81   : > { %s405_s14 = scalar_lea.sflag [#allocation7], %s404_s17 }
  0x82   : > { %s1814_s24 = scalar_lea.vmem [#allocation6], %s1203_s22 }
  0x83   : > { %1511 = dma.done.wait (%p1947_p5), %s405_s14, 192  }
  0x84   : > { %1513 = vsyncadd (%p1947_p5), %s405_s14, 4294967104  ;;  %p1948_p8 = scmp.eq.s32.totalorder %s1633_s9, 0 }
  0x86   : > { %1515 = dma.done.wait (%p1948_p8), [#allocation7], 1024   ;;  %p1949_p11 = pmov %p1948_p8 }
  0x87   : > { %p1950_p3 = pmov %p1948_p8 }
  0x88   : > { %1517 = vsyncadd (%p1949_p11), [#allocation7], 4294966272 }
  0x89   : > { %1519 = dma.done.wait (%p1950_p3), [#allocation10], 2048   ;;  %p1951_p12 = pmov %p1950_p3 }
  0x8a   : > { %v1292_v0 = vld [vmem:[#allocation9 + $0x38] sm:$0xff]   ;;  %v1294_v2 = vld [vmem:[#allocation9 + $0x30] sm:$0xff]   ;;  %v1296_v4 = vld [vmem:[#allocation9 + $0x28] sm:$0xff]   ;;  %s854_s23 = sld [smem:[#allocation2]]  ;;  %s1109_s27 = smul.u32 384, %s1633_s9 }
  0x8b   : > { %1521 = vsyncadd (%p1951_p12), [#allocation10], 4294965248  ;;  %v1293_v1 = vld [vmem:[#allocation8 + $0x38] sm:$0xff]   ;;  %1140 = vmatprep.subr.bf16.mxu0 %v1292_v0  ;;  %v1295_v3 = vld [vmem:[#allocation8 + $0x30] sm:$0xff]   ;;  %s461_s13 = scalar_lea.vmem [#allocation12], %s1202_s29  ;;  %s925_s9 = scalar_lea.sflag [#allocation5], %s1800_s26 }
  0x8c   : > { %1160 = vmatprep.subr.bf16.mxu1 %v1293_v1  ;;  %1141 = vmatpush3.bf16.msra.mxu0 %v1292_v0  ;;  %v1297_v5 = vld [vmem:[#allocation8 + $0x28] sm:$0xff]   ;;  %v1298_v6 = vld [vmem:[#allocation9 + $0x20] sm:$0xff]   ;;  %v1300_v8 = vld [vmem:[#allocation9 + $0x18] sm:$0xff]   ;;  %s938_s11 = sshll.u32 %s461_s13, 4  ;;  %s1864_s22 = scalar_lea.hbm %s1919_s10, %s1109_s27  ;;  %s1866_s11 = int_to_ptr.vmem [resolvable:$true] %s938_s11 }
  0x8d   : > { %1161 = vmatpush3.bf16.msra.mxu1 %v1293_v1  ;;  %1142 = vmatprep.subr.bf16.mxu0 %v1294_v2  ;;  %v1299_v7 = vld [vmem:[#allocation8 + $0x20] sm:$0xff]   ;;  %v1301_v9 = vld [vmem:[#allocation8 + $0x18] sm:$0xff]   ;;  %v1302_v10 = vld [vmem:[#allocation9 + $0x10] sm:$0xff]   ;;  %s1464_s14 = scalar_lea.vmem %s1866_s11, 384  ;;  %p1952_p13 = scmp.ne.s32.totalorder %s1942_s19, 0 }
  0x8e   : > { %1162 = vmatprep.subr.bf16.mxu1 %v1295_v3  ;;  %v1303_v11 = vld [vmem:[#allocation8 + $0x10] sm:$0xff]   ;;  %v1833_v14 = vld [vmem:[%s1806_s25 + $0x8] sm:$0xff]  ;;  %v1304_v15 = vld [vmem:[#allocation9 + $0x8] sm:$0xff]   ;;  %p1465_p9 = scmp.ne.s32.totalorder %s1866_s11, %s1464_s14  ;;  %s1551_s29 = smov [#allocation12]  }
  0x8f   : > { %v1308_v12 = vld [vmem:[%s1814_s24] sm:$0xff]   ;;  %v1306_v18 = vld [vmem:[#allocation9] sm:$0xff]   ;;  %v1309_v21 = vld [vmem:[%s1814_s24 + $0x8] ss:$0 sps:$4 sm:$0xff]   ;;  %s1468_s24 = sshll.u32 %s1551_s29, 4  ;;  %s1469_s24 = int_to_ptr.vmem [resolvable:$false] %s1468_s24 }
  0x90   : > { %1143 = vmatpush3.bf16.msra.mxu0 %v1294_v2  ;;  %v1830_v13 = vld [vmem:[%s1806_s25] sm:$0xff]  ;;  %1156 = vmatprep.mubr.bf16.mxu0 %v1308_v12  ;;  %v1305_v17 = vld [vmem:[#allocation8 + $0x8] sm:$0xff]   ;;  %v1307_v19 = vld [vmem:[#allocation8] sm:$0xff]   ;;  %v855_v1 = vstv %s854_s23  ;;  %p1466_p0 = pnand %p1465_p9, %p1952_p13  ;;  %s1470_s20 = scalar_lea.vmem %s1469_s24, 768 }
  0x91   : > { %1163 = vmatpush3.bf16.msra.mxu1 %v1295_v3  ;;  %1144 = vmatprep.subr.bf16.mxu0 %v1296_v4  ;;  %v469_v16 = vpack.c.bf16 %v1833_v14, %v1830_v13  ;;  %v1838_v20 = vld [vmem:[%s1806_s25 + $0x10] sm:$0xff]  ;;  %v1310_v23 = vld [vmem:[#allocation11 + $0x38] sm:$0xff]   ;;  %v1311_v24 = vld [vmem:[#allocation11 + $0x30] sm:$0xff]   ;;  %p1471_p10 = scmp.lt.s32.totalorder %s1866_s11, %s1469_s24  ;;  %p1472_p1 = scmp.lt.s32.totalorder %s1470_s20, %s1464_s14 }
  0x92   : > { %1164 = vmatprep.subr.bf16.mxu1 %v1297_v5  ;;  %v470_v22 = vpack.c.bf16 %v1838_v20, %v1838_v20  ;;  %v1312_v25 = vld [vmem:[#allocation11 + $0x28] sm:$0xff]   ;;  %v1313_v26 = vld [vmem:[#allocation11 + $0x20] sm:$0xff]   ;;  %v1314_v27 = vld [vmem:[#allocation11 + $0x18] sm:$0xff]   ;;  %p1467_p2 = pneg %p1466_p0 }
  0x93   : > { %1176 = vmatprep.mubr.bf16.mxu1 %v469_v16  ;;  %v1315_v28 = vld [vmem:[#allocation11 + $0x10] sm:$0xff]   ;;  %v1316_v29 = vld [vmem:[#allocation11 + $0x8] sm:$0xff]   ;;  %v1317_v30 = vld [vmem:[#allocation11] sm:$0xff]   ;;  %p1473_p4 = por %p1472_p1, %p1471_p10 }
  0x94   : > { %1145 = vmatpush3.bf16.msra.mxu0 %v1296_v4  ;;  %v1092_v33 = vld [vmem:[%s1913_s4] ss:$0 sm:$0xff] }
  0x95   : > { %1165 = vmatpush3.bf16.msra.mxu1 %v1297_v5  ;;  %1146 = vmatprep.subr.bf16.mxu0 %v1298_v6  ;;  %v1093_v63 = vld [vmem:[%s1915_s6] ss:$0 sm:$0xff]  ;;  %p1474_p6 = pnand %p1473_p4, %p1467_p2 }
  0x96   : > { %1166 = vmatprep.subr.bf16.mxu1 %v1299_v7 }
  0x98   : > { %1147 = vmatpush3.bf16.msra.mxu0 %v1298_v6 }
  0x99   : > { %1167 = vmatpush3.bf16.msra.mxu1 %v1299_v7  ;;  %1148 = vmatprep.subr.bf16.mxu0 %v1300_v8 }
  0x9a   : > { %1168 = vmatprep.subr.bf16.mxu1 %v1301_v9 }
  0x9c   : > { %1149 = vmatpush3.bf16.msra.mxu0 %v1300_v8 }
  0x9d   : > { %1169 = vmatpush3.bf16.msra.mxu1 %v1301_v9  ;;  %1150 = vmatprep.subr.bf16.mxu0 %v1302_v10 }
  0x9e   : > { %1170 = vmatprep.subr.bf16.mxu1 %v1303_v11 }
  0xa0   : > { %1151 = vmatpush3.bf16.msra.mxu0 %v1302_v10 }
  0xa1   : > { %1171 = vmatpush3.bf16.msra.mxu1 %v1303_v11  ;;  %1152 = vmatprep.subr.bf16.mxu0 %v1304_v15 }
  0xa2   : > { %1172 = vmatprep.subr.bf16.mxu1 %v1305_v17 }
  0xa4   : > { %1153 = vmatpush3.bf16.msra.mxu0 %v1304_v15 }
  0xa5   : > { %1173 = vmatpush3.bf16.msra.mxu1 %v1305_v17  ;;  %1154 = vmatprep.subr.bf16.mxu0 %v1306_v18 }
  0xa6   : > { %1174 = vmatprep.subr.bf16.mxu1 %v1307_v19 }
  0xa8   : > { %1155 = vmatpush3.bf16.msra.mxu0 %v1306_v18 }
  0xa9   : > { %1175 = vmatpush3.bf16.msra.mxu1 %v1307_v19  ;;  %1180 = vmatprep.subr.bf16.mxu0 %v1310_v23 }
  0xab   : > { %1157 = vmatmul.mubr.bf16.vlgmr.msra.gmra.mxu0 %v1309_v21 }
  0xac   : > { %1177 = vmatmul.mubr.bf16.vlgmr.msra.gmra.mxu1 %v470_v22  ;;  %1181 = vmatpush3.bf16.msra.mxu0 %v1310_v23 }
  0xad   : > { %1182 = vmatprep.subr.bf16.mxu0 %v1311_v24 }
  0xb0   : > { %1183 = vmatpush3.bf16.msra.mxu0 %v1311_v24 }
  0xb1   : > { %1184 = vmatprep.subr.bf16.mxu0 %v1312_v25 }
  0xb4   : > { %1185 = vmatpush3.bf16.msra.mxu0 %v1312_v25 }
  0xb5   : > { %1186 = vmatprep.subr.bf16.mxu0 %v1313_v26 }
  0xb8   : > { %1187 = vmatpush3.bf16.msra.mxu0 %v1313_v26 }
  0xb9   : > { %1188 = vmatprep.subr.bf16.mxu0 %v1314_v27 }
  0xbc   : > { %1189 = vmatpush3.bf16.msra.mxu0 %v1314_v27 }
  0xbd   : > { %1190 = vmatprep.subr.bf16.mxu0 %v1315_v28 }
  0xc0   : > { %1191 = vmatpush3.bf16.msra.mxu0 %v1315_v28 }
  0xc1   : > { %1192 = vmatprep.subr.bf16.mxu0 %v1316_v29 }
  0xc4   : > { %1193 = vmatpush3.bf16.msra.mxu0 %v1316_v29 }
  0xc5   : > { %1194 = vmatprep.subr.bf16.mxu0 %v1317_v30 }
  0xc8   : > { %1195 = vmatpush3.bf16.msra.mxu0 %v1317_v30 }
 0x16b   : > { %v1158_v31 = vpop.f32.mrf.mxu0 }
 0x16c   : > { %v1178_v32 = vpop.f32.mrf.mxu1 }
 0x16d   : > { %v703_v34 = vadd.f32 %v1178_v32, %v1158_v31  ;;  %v598_v35 = vpop.f32.mrf.mxu0 }
 0x16e   : > { %v694_v36 = vpop.f32.mrf.mxu1 }
 0x16f   : > { %v717_v37 = vadd.f32 %v1092_v33, %v703_v34  ;;  %v695_v38 = vadd.f32 %v694_v36, %v598_v35  ;;  %v1159_v39 = vpop.f32.mrf.mxu0 }
 0x170   : > { %v1179_v40 = vpop.f32.mrf.mxu1 }
 0x171   : > { %v723_v41 = vmul.f32 0.70710677, %v717_v37  ;;  %v715_v42 = vadd.f32 %v1092_v33, %v695_v38  ;;  %v601_v43 = vpop.f32.mrf.mxu0  ;;  %v720_v54 = vmul.f32 0.5, %v717_v37  ;;  %v1102_v40 = vld [vmem:[%s1916_s7] ss:$0 sm:$0xff] }
 0x172   : > { %v697_v44 = vpop.f32.mrf.mxu1 }
 0x173   : > { %v721_v45 = vmul.f32 0.70710677, %v715_v42  ;;  %v698_v46 = vadd.f32 %v697_v44, %v601_v43  ;;  %1318 = verf.f32 %v723_v41  ;;  %v718_v55 = vmul.f32 0.5, %v715_v42  ;;  %v1103_v42 = vld [vmem:[%s1917_s8] ss:$0 sm:$0xff] }
 0x175   : > { %1320 = verf.f32 %v721_v45  ;;  %v716_v47 = vadd.f32 %v1092_v33, %v698_v46 }
 0x177   : > { %v722_v48 = vmul.f32 0.70710677, %v716_v47  ;;  %v719_v56 = vmul.f32 0.5, %v716_v47 }
 0x179   : > { %1322 = verf.f32 %v722_v48 }
 0x180   : > { %v1319_v49 = vpop.eup %1318 }
 0x181   : > { %v729_v51 = vadd.f32 1.0, %v1319_v49 }
 0x182   : > { %v1321_v50 = vpop.eup %1320 }
 0x183   : > { %v727_v52 = vadd.f32 1.0, %v1321_v50  ;;  %v732_v58 = vmul.f32 %v729_v51, %v720_v54 }
 0x185   : > { %v730_v59 = vmul.f32 %v727_v52, %v718_v55  ;;  %v734_v62 = vpack.c.bf16 %v732_v58, %v732_v58 }
 0x186   : > { %v1323_v53 = vpop.eup %1322 }
 0x187   : > { %v728_v57 = vadd.f32 1.0, %v1323_v53 }
 0x189   : > { %v731_v60 = vmul.f32 %v728_v57, %v719_v56 }
 0x18b   : > { %v733_v61 = vpack.c.bf16 %v731_v60, %v730_v59 }
 0x18d   : > { %1196 = vmatprep.mubr.bf16.mxu0 %v733_v61 }
 0x18e   : > { %1197 = vmatmul.mubr.bf16.vlgmr.msra.gmra.mxu0 %v734_v62 }
 0x24e   : > { %v1198_v0 = vpop.f32.mrf.mxu0 }
 0x24f   : > { %v849_v2 = vadd.f32 %v1198_v0, %v1093_v63 }
 0x250   : > { %v840_v3 = vpop.f32.mrf.mxu0 }
 0x251   : > { %v858_v4 = vmul.f32 %v855_v1, %v849_v2  ;;  %v841_v5 = vadd.f32 %v1093_v63, %v840_v3 }
 0x252   : > { %v1199_v6 = vpop.f32.mrf.mxu0 }
 0x253   : > { %v856_v7 = vmul.f32 %v855_v1, %v841_v5  ;;  %v861_v8 = vadd.f32 %v858_v4, %v1838_v20 }
 0x254   : > { %v843_v9 = vpop.f32.mrf.mxu0 }
 0x255   : > { %v844_v10 = vadd.f32 %v1093_v63, %v843_v9  ;;  %866 = vadd.xlane.f32.xlu1 %v861_v8  ;;  %v859_v11 = vadd.f32 %v856_v7, %v1830_v13  ;;  %v873_v17 = vmul.f32 %v861_v8, %v861_v8 }
 0x257   : > { %v857_v12 = vmul.f32 %v855_v1, %v844_v10  ;;  %862 = vadd.xlane.f32.xlu0 %v859_v11  ;;  %v871_v15 = vmul.f32 %v859_v11, %v859_v11 }
 0x259   : > { %874 = vadd.xlane.f32.xlu1 %v871_v15  ;;  %v860_v16 = vadd.f32 %v857_v12, %v1833_v14 }
 0x25b   : > { %864 = vadd.xlane.f32.xlu0 %v860_v16  ;;  %v872_v18 = vmul.f32 %v860_v16, %v860_v16 }
 0x25d   : > { %878 = vadd.xlane.f32.xlu1 %v873_v17 }
 0x25f   : > { %876 = vadd.xlane.f32.xlu0 %v872_v18 }
 0x2de   : > { %v867_v19 = vpop.xlane.xlu1 %866 }
 0x2df   : > { %v870_v23 = vmul.f32 0.03125, %v867_v19 }
 0x2e0   : > { %v863_v21 = vpop.xlane.xlu0 %862 }
 0x2e1   : > { %v868_v22 = vmul.f32 0.03125, %v863_v21  ;;  %v885_v29 = vmul.f32 %v870_v23, %v870_v23  ;;  %v891_v43 = vsub.f32 %v861_v8, %v870_v23 }
 0x2e2   : > { %v875_v20 = vpop.xlane.xlu1 %874 }
 0x2e3   : > { %v883_v24 = vmul.f32 %v868_v22, %v868_v22  ;;  %v880_v25 = vmul.f32 0.03125, %v875_v20  ;;  %v889_v38 = vsub.f32 %v859_v11, %v868_v22 }
 0x2e4   : > { %v865_v26 = vpop.xlane.xlu0 %864 }
 0x2e5   : > { %v886_v13 = vsub.f32 %v880_v25, %v883_v24  ;;  %v869_v27 = vmul.f32 0.03125, %v865_v26 }
 0x2e6   : > { %v879_v28 = vpop.xlane.xlu1 %878 }
 0x2e7   : > { %v892_v30 = vadd.f32 1e-05, %v886_v13  ;;  %v882_v31 = vmul.f32 0.03125, %v879_v28  ;;  %v884_v32 = vmul.f32 %v869_v27, %v869_v27  ;;  %v890_v47 = vsub.f32 %v860_v16, %v869_v27 }
 0x2e8   : > { %v877_v14 = vpop.xlane.xlu0 %876 }
 0x2e9   : > { %1324 = vrsqrt.f32 %v892_v30  ;;  %v888_v33 = vsub.f32 %v882_v31, %v885_v29  ;;  %v881_v34 = vmul.f32 0.03125, %v877_v14 }
 0x2eb   : > { %v894_v35 = vadd.f32 1e-05, %v888_v33  ;;  %v887_v36 = vsub.f32 %v881_v34, %v884_v32 }
 0x2ed   : > { %1326 = vrsqrt.f32 %v894_v35  ;;  %v893_v37 = vadd.f32 1e-05, %v887_v36 }
 0x2ef   : > { %1328 = vrsqrt.f32 %v893_v37 }
 0x2f6   : > { %v1325_v39 = vpop.eup %1324 }
 0x2f7   : > { %v898_v41 = vmul.f32 %v1325_v39, %v889_v38 }
 0x2f9   : > { %v908_v44 = vmul.f32 %v1102_v40, %v898_v41 }
 0x2fa   : > { %v1327_v45 = vpop.eup %1326 }
 0x2fb   : > { %v918_v46 = vadd.f32 %v1103_v42, %v908_v44  ;;  %v900_v48 = vmul.f32 %v1327_v45, %v891_v43 }
 0x2fc   : > { %v1329_v49 = vpop.eup %1328 }
 0x2fd   : > { %v910_v50 = vmul.f32 %v1102_v40, %v900_v48  ;;  %v899_v51 = vmul.f32 %v1329_v49, %v890_v47  ;;  %921 = vst [vmem:[%s461_s13] sm:$0xff] %v918_v46 }
 0x2ff   : > { %v920_v52 = vadd.f32 %v1103_v42, %v910_v50  ;;  %v909_v53 = vmul.f32 %v1102_v40, %v899_v51 }
 0x301   : > { %v919_v54 = vadd.f32 %v1103_v42, %v909_v53  ;;  %923 = vst [vmem:[%s461_s13 + $0x10] sm:$0xff] %v920_v52 }
 0x303   : > { %922 = vst [vmem:[%s461_s13 + $0x8] sm:$0xff] %v919_v54 }
 0x304   : > { %1477 = shalt.err (!%p1474_p6)
}
 0x305   : > { %s1478_s12 = scalar_lea.hbm %s1864_s22, 384  ;;  %s1482_s2 = scalar_lea.hbm %s1919_s10, 768 }
 0x306   : > { %p1479_p7 = scmp.ne.s32.totalorder %s1864_s22, %s1478_s12  ;;  %p1483_p11 = scmp.lt.s32.totalorder %s1864_s22, %s1919_s10 }
 0x307   : > { %p1484_p3 = scmp.lt.s32.totalorder %s1482_s2, %s1478_s12 }
 0x308   : > { %p1480_p5 = pnand %p1479_p7, %p1952_p13 }
 0x309   : > { %p1485_p12 = por %p1484_p3, %p1483_p11 }
 0x30a   : > { %p1481_p8 = pneg %p1480_p5 }
 0x30c   : > { %p1486_p9 = pnand %p1485_p12, %p1481_p8 }
 0x30e   : > { %1489 = shalt.err (!%p1486_p9)
}
 0x30f   : > { %s1552_s5 = smov 128   ;;  %s1553_s28 = smov 8  }
 0x310   : > { %1220 = dma.vmem_to_hbm [thread:$0]  (%p1952_p13), %s1866_s11, 384, %s1864_s22, %s925_s9, %s1552_s5, %s1552_s5, %s1553_s28  }
 0x311 PF: > { %s953_s27 = sand.u32 1, %s1528_s15   ;;  %p1953_p0 = scmp.ne.s32.totalorder %s1934_s21, 0 }
 0x312   : > { %p1954_p2 = scmp.ge.s32.totalorder %s1540_s18, 2  ;;  %s954_s13 = scalar_lea.sflag [#allocation5], %s953_s27 }
 0x314   : > { %p1240_p10 = pnand %p1954_p2, %p1953_p0 }
 0x316   : > { %p1241_p1 = pneg %p1240_p10 }
 0x318   : > { %1523 = dma.done.wait (%p1241_p1), %s954_s13, 384  }
 0x319   : > { %1525 = vsyncadd (%p1241_p1), %s954_s13, 4294966912  ;;  %s1955_s18 = sld [smem:[#allocation19_spill]]  ;;  %s1958_s15 = smov %s1532_s16 }
 0x31a   : > { %s1956_s25 = sld [smem:[#allocation18_spill]] }
 0x31b   : > { %s1957_s17 = sld [smem:[#allocation20_spill]] }
 0x31f   : > { %p28_p4 = scmp.ge.s32.totalorder %s1955_s18, 4  }
 0x320   : > { %s1959_s16 = smov %s1956_s25 }
 0x321   :  { %30 = sbr.rel (!%p28_p4) target bundleno = 14 (0xe), region = 130 }
 0x326   :  { %959 = vsyncpa [#allocation4], 1 }
 0x327   :  { %961 = vsyncpa [#allocation4 + $0x1], 1 }
 0x328   :  { %962 = vsyncpa [#allocation7], 1 }
 0x329   :  { %964 = vsyncpa [#allocation7 + $0x1], 1 }
 0x32a   :  { %965 = vsyncpa [#allocation10], 1 }
 0x32b   :  { %966 = vsyncpa [#allocation5], 1 }
 0x32c   :  { %968 = vsyncpa [#allocation5 + $0x1], 1 }

</bundles_post_ra>
